<compile_context>
chip_gen: v7x
topology: tpu7x:2x2x1
jax: 0.10.0
libtpu: 0.0.40
codegen_flags: <defaults>
</compile_context>

<pallas_src>
import functools
import math

import jax
import jax.numpy as jnp
from jax.experimental import pallas as pl
from jax.experimental.pallas import tpu as pltpu

_LANE = 128
_STEM_KPAD = 128          # 3*3*3 = 27 taps, zero-padded to one full lane group


def _default_vmem_limit():
    # Generation dispatch: ~3/4 of physical VMEM (v5e/v6e 128 MiB -> 96 MiB,
    # v7x 64 MiB -> 48 MiB).  Conservative fallback if the query fails.
    try:
        cap = pltpu.get_tpu_info().vmem_capacity_bytes
        return int(min(cap * 3 // 4, 100 * 1024 * 1024))
    except Exception:
        return 48 * 1024 * 1024


_VMEM_LIMIT = _default_vmem_limit()
_MAX_TM = 1024 if _VMEM_LIMIT >= (80 << 20) else 512   # bigger row tiles on 128 MiB parts


def _cpad(c):
    """Pad a channel count up to a multiple of 128 (lane-dense)."""
    return ((c + _LANE - 1) // _LANE) * _LANE


def _pick_tn(n, k):
    # Cap the N tile when K is very large (b4-b7 project layers) so the
    # double-buffered working set stays comfortably inside v7x VMEM.
    cands = (256, 128) if k >= 2048 else (512, 384, 256, 128)
    for cand in cands:
        if n % cand == 0:
            return cand
    return n


def _pick_tm(m, max_tm=None):
    """Row-tile for the matmul M axis: largest divisor of M that is a multiple
    of 8 (no padding / slicing round-trips).  Returns (tm, padded_M)."""
    if max_tm is None:
        max_tm = _MAX_TM
    if m <= max_tm:
        return m, m                       # single full-extent block
    for d in range(max_tm, 7, -8):        # multiples of 8, descending
        if m % d == 0:
            return d, m
    mp = ((m + 255) // 256) * 256         # rare fallback: pad M (never hit here)
    return 256, mp


def _pick_th(Ho, Wo, tc):
    """Output-row tile for the depthwise kernel (keeps the f32 partial sum small)."""
    if Ho <= 8:
        return Ho
    best = Ho
    for cand in (32, 16, 8, 4, 2):
        if Ho % cand == 0:
            best = cand
            if cand * Wo * tc * 4 <= 512 * 1024:
                return cand
    return best


# ----------------------------------------------------------------------------
# Kernel 1: tiled 1x1-conv matmul, fused BN + activation (+ SE scale, + residual)
# x / w / se / res are bf16 (MXU operands), accumulation and BN epilogue in f32.
# ----------------------------------------------------------------------------

def _mm_kernel(*refs, act, has_se, has_res):
    x_ref, w_ref, s_ref, b_ref = refs[:4]
    idx = 4
    se_ref = res_ref = None
    if has_se:
        se_ref = refs[idx]; idx += 1
    if has_res:
        res_ref = refs[idx]; idx += 1
    o_ref = refs[idx]

    x = x_ref[0]                              # (tm, K) bf16, DMA'd directly
    if has_se:
        x = x * se_ref[0]                     # per-batch per-channel SE gate (bf16)
    y = jnp.dot(x, w_ref[...], preferred_element_type=jnp.float32)   # MXU, f32 acc
    y = y * s_ref[...] + b_ref[...]           # folded BN (f32)
    if act == "silu":
        y = y * jax.nn.sigmoid(y)
    if has_res:
        y = y + res_ref[0]                    # bf16 residual, promoted to f32
    o_ref[0] = y.astype(o_ref.dtype)


@functools.lru_cache(maxsize=None)
def _build_matmul(B, M, K, N, tm, tn, act, has_se, has_res, out_dtype):
    in_specs = [
        pl.BlockSpec((1, tm, K), lambda b, i, j: (b, i, 0)),
        pl.BlockSpec((K, tn), lambda b, i, j: (0, j)),
        pl.BlockSpec((1, tn), lambda b, i, j: (0, j)),
        pl.BlockSpec((1, tn), lambda b, i, j: (0, j)),
    ]
    if has_se:
        in_specs.append(pl.BlockSpec((1, 1, K), lambda b, i, j: (b, 0, 0)))
    if has_res:
        in_specs.append(pl.BlockSpec((1, tm, tn), lambda b, i, j: (b, i, j)))
    f = pl.pallas_call(
        functools.partial(_mm_kernel, act=act, has_se=has_se, has_res=has_res),
        out_shape=jax.ShapeDtypeStruct((B, M, N), out_dtype),
        grid=(B, M // tm, N // tn),
        in_specs=in_specs,
        out_specs=pl.BlockSpec((1, tm, tn), lambda b, i, j: (b, i, j)),
        compiler_params=pltpu.CompilerParams(
            dimension_semantics=("parallel", "parallel", "parallel"),
            vmem_limit_bytes=_VMEM_LIMIT),
    )
    return jax.jit(f)


def matmul_fused(x, w, scale, bias, act="none", se=None, res=None,
                 out_dtype=jnp.bfloat16):
    """x: (B, M, K) bf16, w: (K, N) bf16, scale/bias: (1, N) f32."""
    B, M, K = x.shape
    N = w.shape[1]
    tm, Mp = _pick_tm(M)
    tn = _pick_tn(N, K)
    if Mp != M:   # rare fallback; never triggers for EfficientNet feature maps
        x = jnp.pad(x, ((0, 0), (0, Mp - M), (0, 0)))
        if res is not None:
            res = jnp.pad(res, ((0, 0), (0, Mp - M), (0, 0)))
    args = [x, w, scale, bias]
    if se is not None:
        args.append(se)
    if res is not None:
        args.append(res)
    out = _build_matmul(B, Mp, K, N, tm, tn, act,
                        se is not None, res is not None, out_dtype)(*args)
    if Mp != M:
        out = out[:, :M]
    return out


# ----------------------------------------------------------------------------
# Phase decomposition (wrapper-side, pure XLA pad+reshape+transpose).
# For stride s, phases[b*s*s + rh*s + rw, i, j, c] = x_padded[b, s*i+rh, s*j+rw, c]
# so every conv tap becomes a contiguous ref slice and the strided output is
# computed directly inside the kernel.
# ----------------------------------------------------------------------------

def _phase_split(x, K, stride, pad):
    B, H, W, C = x.shape
    Ho = (H + 2 * pad - K) // stride + 1
    Wo = (W + 2 * pad - K) // stride + 1
    Hph = Ho + (K - 1) // stride
    Wph = Wo + (K - 1) // stride
    Hp2, Wp2 = stride * Hph, stride * Wph
    xp = jnp.pad(x, ((0, 0), (pad, Hp2 - H - pad), (pad, Wp2 - W - pad), (0, 0)))
    ph = xp.reshape(B, Hph, stride, Wph, stride, C)
    ph = ph.transpose(0, 2, 4, 1, 3, 5)
    ph = ph.reshape(B * stride * stride, Hph, Wph, C)
    return ph, Ho, Wo, Hph, Wph


# ----------------------------------------------------------------------------
# Kernel 2: depthwise KxK conv (strided, row-tiled) + BN + SiLU, bf16 output.
# Also accumulates the spatial mean for the SE squeeze into a resident output
# block across the row-tile grid axis (P3 accumulator pattern).
# ----------------------------------------------------------------------------

def _dw_kernel(x_ref, w_ref, s_ref, b_ref, o_ref, p_ref, *,
               K, stride, th, Wo, nh, inv_hw):
    h = pl.program_id(2)
    tc = o_ref.shape[-1]
    row0 = h * th
    if th % 8 == 0:
        row0 = pl.multiple_of(row0, 8)

    # Register-blocked accumulation: all K*K taps for this row tile are summed
    # into a local value before the single BN+SiLU epilogue and store.
    acc = jnp.zeros((th, Wo, tc), jnp.float32)
    for kh in range(K):
        for kw in range(K):
            rh, qh = kh % stride, kh // stride
            rw, qw = kw % stride, kw // stride
            # TODO(synk): qw shifts the sublane axis; use pltpu.roll to avoid
            # a potential tile-sized copy per tap.
            patch = x_ref[rh * stride + rw, pl.ds(row0 + qh, th), pl.ds(qw, Wo), :]
            acc = acc + patch.astype(jnp.float32) * w_ref[kh, kw]
    y = acc * s_ref[0] + b_ref[0]
    y = y * jax.nn.sigmoid(y)                 # SiLU
    o_ref[0] = y.astype(o_ref.dtype)

    @pl.when(h == 0)
    def _():
        p_ref[...] = jnp.zeros_like(p_ref)

    p_ref[...] += jnp.sum(y, axis=(0, 1)).reshape(1, tc)

    @pl.when(h == nh - 1)
    def _():
        p_ref[...] *= inv_hw


@functools.lru_cache(maxsize=None)
def _build_dwconv(B, ss, Hph, Wph, C, tc, K, stride, Ho, Wo, th):
    nh = Ho // th
    f = pl.pallas_call(
        functools.partial(_dw_kernel, K=K, stride=stride, th=th, Wo=Wo, nh=nh,
                          inv_hw=1.0 / (Ho * Wo)),
        out_shape=(jax.ShapeDtypeStruct((B, Ho, Wo, C), jnp.bfloat16),
                   jax.ShapeDtypeStruct((B, C), jnp.float32)),
        grid=(B, C // tc, nh),
        in_specs=[
            # Input block index ignores h -> fetched once per (batch, c-tile).
            pl.BlockSpec((ss, Hph, Wph, tc), lambda b, c, h: (b, 0, 0, c)),
            pl.BlockSpec((K, K, tc), lambda b, c, h: (0, 0, c)),
            pl.BlockSpec((1, tc), lambda b, c, h: (0, c)),
            pl.BlockSpec((1, tc), lambda b, c, h: (0, c)),
        ],
        out_specs=(
            pl.BlockSpec((1, th, Wo, tc), lambda b, c, h: (b, h, 0, c)),
            pl.BlockSpec((1, tc), lambda b, c, h: (b, c)),   # resident across h
        ),
        compiler_params=pltpu.CompilerParams(
            dimension_semantics=("parallel", "parallel", "arbitrary"),
            vmem_limit_bytes=_VMEM_LIMIT),
    )
    return jax.jit(f)


def dwconv_bn_silu(x, w, scale, bias, K, stride):
    B, H, W, C = x.shape
    pad = (K - 1) // 2
    ph, Ho, Wo, Hph, Wph = _phase_split(x, K, stride, pad)
    tc = 256 if (C % 256 == 0 and C >= 256) else 128
    th = _pick_th(Ho, Wo, tc)
    return _build_dwconv(B, stride * stride, Hph, Wph, C, tc, K, stride,
                         Ho, Wo, th)(ph, w, scale, bias)


# ----------------------------------------------------------------------------
# Stem 3x3 stride-2 conv: tiny wrapper-side im2col (27 taps -> 128 lanes, bf16)
# then the fused MXU matmul kernel (BN + SiLU fused).  The im2col tensor is a
# few MB even at 600 px, so no dedicated stem kernel is needed.
# ----------------------------------------------------------------------------

def stem_conv(x, w_mat, scale, bias, K=3, stride=2, pad=1):
    B, H, W, Cin = x.shape
    Ho = (H + 2 * pad - K) // stride + 1
    Wo = (W + 2 * pad - K) // stride + 1
    xp = jnp.pad(x, ((0, 0), (pad, pad), (pad, pad), (0, 0)))
    taps = []
    for kh in range(K):
        for kw in range(K):
            taps.append(xp[:, kh:kh + stride * Ho:stride,
                           kw:kw + stride * Wo:stride, :])
    patches = jnp.concatenate(taps, axis=-1)            # (B, Ho, Wo, K*K*Cin)
    kdim = K * K * Cin
    patches = jnp.pad(patches, ((0, 0), (0, 0), (0, 0), (0, _STEM_KPAD - kdim)))
    patches = patches.astype(jnp.bfloat16).reshape(B, Ho * Wo, _STEM_KPAD)
    out = matmul_fused(patches, w_mat, scale, bias, act="silu")
    return out.reshape(B, Ho, Wo, -1)


# ----------------------------------------------------------------------------
# Kernel 3: head 1x1 conv + BN + SiLU fused with the global average pool.
# ----------------------------------------------------------------------------

def _head_pool_kernel(x_ref, w_ref, s_ref, b_ref, o_ref, *, inv_m):
    y = jnp.dot(x_ref[0], w_ref[...], preferred_element_type=jnp.float32)
    y = y * s_ref[...] + b_ref[...]
    y = y * jax.nn.sigmoid(y)
    o_ref[...] = (jnp.sum(y, axis=0, keepdims=True) * inv_m).astype(o_ref.dtype)


@functools.lru_cache(maxsize=None)
def _build_head_pool(B, M, K, N, tn):
    f = pl.pallas_call(
        functools.partial(_head_pool_kernel, inv_m=1.0 / M),
        out_shape=jax.ShapeDtypeStruct((B, N), jnp.float32),
        grid=(B, N // tn),
        in_specs=[
            pl.BlockSpec((1, M, K), lambda b, j: (b, 0, 0)),
            pl.BlockSpec((K, tn), lambda b, j: (0, j)),
            pl.BlockSpec((1, tn), lambda b, j: (0, j)),
            pl.BlockSpec((1, tn), lambda b, j: (0, j)),
        ],
        out_specs=pl.BlockSpec((1, tn), lambda b, j: (b, j)),
        compiler_params=pltpu.CompilerParams(
            dimension_semantics=("parallel", "parallel"),
            vmem_limit_bytes=_VMEM_LIMIT),
    )
    return jax.jit(f)


def head_pool(x, w, scale, bias):
    B, M, K = x.shape
    N = w.shape[1]
    tn = _pick_tn(N, K)
    return _build_head_pool(B, M, K, N, tn)(x, w, scale, bias)


# ----------------------------------------------------------------------------
# EfficientNet configuration / parameters / forward
# ----------------------------------------------------------------------------

_B_SCALING = {        # (width_mult, depth_mult)
    "efficientnet_b0": (1.0, 1.0), "efficientnet_b1": (1.0, 1.1),
    "efficientnet_b2": (1.1, 1.2), "efficientnet_b3": (1.2, 1.4),
    "efficientnet_b4": (1.4, 1.8), "efficientnet_b5": (1.6, 2.2),
    "efficientnet_b6": (1.8, 2.6), "efficientnet_b7": (2.0, 3.1),
}

_BASE_STAGES = [
    # expand_ratio, kernel, stride, in_ch, out_ch, num_layers
    (1, 3, 1, 32, 16, 1),
    (6, 3, 2, 16, 24, 2),
    (6, 5, 2, 24, 40, 2),
    (6, 3, 2, 40, 80, 3),
    (6, 5, 1, 80, 112, 3),
    (6, 5, 2, 112, 192, 4),
    (6, 3, 1, 192, 320, 1),
]


def _make_divisible(v, divisor=8, min_value=None):
    if min_value is None:
        min_value = divisor
    new_v = max(min_value, int(v + divisor / 2) // divisor * divisor)
    if new_v < 0.9 * v:
        new_v += divisor
    return new_v


class _EfficientNetPallas:
    def __init__(self, model_name, num_classes=1000, seed=0):
        self._key = jax.random.PRNGKey(seed)
        self.num_classes = num_classes
        self.params = self._build_params(model_name, num_classes)

    # -------- deterministic parameter construction (synthetic, BN folded) ----
    def _nkey(self):
        self._key, sub = jax.random.split(self._key)
        return sub

    def _conv1x1(self, cin, cout):
        w = jax.random.normal(self._nkey(), (cin, cout), jnp.float32)
        w = w * math.sqrt(2.0 / cin)
        wp = jnp.zeros((_cpad(cin), _cpad(cout)), jnp.float32)
        wp = wp.at[:cin, :cout].set(w)
        return wp.astype(jnp.bfloat16)

    def _bn(self, c, eps=1e-5):
        # torch BatchNorm2d init: gamma=1, beta=0, mean=0, var=1 -> fold.
        cp = _cpad(c)
        scale = jnp.zeros((1, cp), jnp.float32).at[:, :c].set(
            1.0 / math.sqrt(1.0 + eps))
        bias = jnp.zeros((1, cp), jnp.float32)
        return scale, bias

    def _dw_weight(self, K, c):
        w = jax.random.normal(self._nkey(), (K, K, c), jnp.float32)
        w = w * math.sqrt(2.0 / (K * K))
        return jnp.zeros((K, K, _cpad(c)), jnp.float32).at[:, :, :c].set(w)

    def _build_params(self, model_name, num_classes):
        width_mult, depth_mult = _B_SCALING[model_name]

        def adjust_channels(c):
            return _make_divisible(c * width_mult, 8)

        def adjust_depth(d):
            return int(math.ceil(d * depth_mult))

        params = {}

        # stem: 3x3 stride-2 conv expressed as an im2col matmul weight
        stem_out = adjust_channels(32)
        kdim = 3 * 3 * 3
        sw = jax.random.normal(self._nkey(), (kdim, stem_out), jnp.float32)
        sw = sw * math.sqrt(2.0 / kdim)
        swp = jnp.zeros((_STEM_KPAD, _cpad(stem_out)), jnp.float32)
        swp = swp.at[:kdim, :stem_out].set(sw)
        ss_, sb_ = self._bn(stem_out)
        params["stem"] = {"w": swp.astype(jnp.bfloat16), "scale": ss_, "bias": sb_}

        blocks = []
        in_ch = stem_out
        for (expand, k, stride, _bin, bout, layers) in _BASE_STAGES:
            out_ch = adjust_channels(bout)
            nlayers = adjust_depth(layers)
            for i in range(nlayers):
                block_in = in_ch if i == 0 else out_ch
                block_stride = stride if i == 0 else 1
                expanded = _make_divisible(block_in * expand, 8)
                bp = {"cfg": {"k": k, "stride": block_stride,
                              "use_res": block_stride == 1 and block_in == out_ch}}
                if expanded != block_in:
                    es, eb = self._bn(expanded)
                    bp["expand"] = {"w": self._conv1x1(block_in, expanded),
                                    "scale": es, "bias": eb}
                ds_, db_ = self._bn(expanded)
                bp["dw"] = {"w": self._dw_weight(k, expanded),
                            "scale": ds_, "bias": db_}
                sq = max(1, block_in // 4)
                cp, sp = _cpad(expanded), _cpad(sq)
                w1 = jax.random.normal(self._nkey(), (expanded, sq),
                                       jnp.float32) * math.sqrt(2.0 / expanded)
                w2 = jax.random.normal(self._nkey(), (sq, expanded),
                                       jnp.float32) * math.sqrt(2.0 / sq)
                bp["se"] = {
                    "w1": jnp.zeros((cp, sp), jnp.float32).at[:expanded, :sq].set(w1),
                    "b1": jnp.zeros((1, sp), jnp.float32),
                    "w2": jnp.zeros((sp, cp), jnp.float32).at[:sq, :expanded].set(w2),
                    "b2": jnp.zeros((1, cp), jnp.float32),
                }
                ps, pb = self._bn(out_ch)
                bp["proj"] = {"w": self._conv1x1(expanded, out_ch),
                              "scale": ps, "bias": pb}
                blocks.append(bp)
            in_ch = out_ch
        params["blocks"] = blocks

        head_out = 4 * in_ch
        hs, hb = self._bn(head_out)
        params["head"] = {"w": self._conv1x1(in_ch, head_out),
                          "scale": hs, "bias": hb}

        ncp = _cpad(num_classes)
        cw = jax.random.normal(self._nkey(), (head_out, num_classes),
                               jnp.float32) * 0.01
        cwp = jnp.zeros((_cpad(head_out), ncp), jnp.float32)
        cwp = cwp.at[:head_out, :num_classes].set(cw)
        params["classifier"] = {
            "w": cwp.astype(jnp.bfloat16),
            "scale": jnp.ones((1, ncp), jnp.float32),
            "bias": jnp.zeros((1, ncp), jnp.float32),
        }
        return params

    # -------- forward --------
    def _mbconv(self, x, bp):
        cfg = bp["cfg"]
        B, H, W, C = x.shape
        inp = x                                             # bf16
        if "expand" in bp:
            e = bp["expand"]
            xe = matmul_fused(x.reshape(B, H * W, C), e["w"], e["scale"],
                              e["bias"], act="silu")
            C = e["w"].shape[1]
            x = xe.reshape(B, H, W, C)
        d = bp["dw"]
        y, pooled = dwconv_bn_silu(x, d["w"], d["scale"], d["bias"],
                                   cfg["k"], cfg["stride"])
        # SE excitation: two tiny FCs on the pooled (B, C) vector.  Plain XLA
        # (removes a sub-microsecond kernel launch per block); the gate is
        # applied to the K-dim input inside the project matmul kernel.
        s = bp["se"]
        h = pooled @ s["w1"] + s["b1"]
        h = h * jax.nn.sigmoid(h)
        gate = jax.nn.sigmoid(h @ s["w2"] + s["b2"])
        se_scale = gate.astype(jnp.bfloat16)
        pr = bp["proj"]
        B2, Ho, Wo, Ce = y.shape
        # StochasticDepth is identity at inference -> plain residual add,
        # fused into the project matmul together with the SE channel scale.
        res = inp.reshape(B, Ho * Wo, inp.shape[-1]) if cfg["use_res"] else None
        out = matmul_fused(y.reshape(B2, Ho * Wo, Ce), pr["w"], pr["scale"],
                           pr["bias"], act="none",
                           se=se_scale.reshape(B2, 1, Ce), res=res)
        return out.reshape(B2, Ho, Wo, pr["w"].shape[1])

    def __call__(self, x_nchw):
        x = jnp.transpose(x_nchw.astype(jnp.float32), (0, 2, 3, 1))   # -> NHWC
        p = self.params
        st = p["stem"]
        x = stem_conv(x, st["w"], st["scale"], st["bias"], K=3, stride=2, pad=1)
        for bp in p["blocks"]:
            x = self._mbconv(x, bp)
        hd = p["head"]
        B, H, W, C = x.shape
        feats = head_pool(x.reshape(B, H * W, C), hd["w"], hd["scale"],
                          hd["bias"])                     # fused avgpool -> (B, Ch)
        # dropout before classifier: identity in eval mode
        fc = p["classifier"]
        logits = matmul_fused(feats.astype(jnp.bfloat16)[None], fc["w"],
                              fc["scale"], fc["bias"], act="none",
                              out_dtype=jnp.float32)[0]
        return logits[:, :self.num_classes]


class EfficientNet:
    """Pallas-TPU re-implementation of the PyTorch EfficientNet wrapper."""

    def __init__(self, model_name, pretrained=False, progress=True,
                 stochastic_depth_prob=0.2, num_classes=1000,
                 block=None, norm_layer=None):
        assert model_name in ['efficientnet_b0', 'efficientnet_b1',
                              'efficientnet_b2', 'efficientnet_b3',
                              'efficientnet_b4', 'efficientnet_b5',
                              'efficientnet_b6', 'efficientnet_b7']
        # pretrained weights are not loadable here; deterministic synthetic init.
        self.model = _EfficientNetPallas(model_name, num_classes=num_classes)

    def forward(self, x):
        return {"output": self.model(x)}

    __call__ = forward


if __name__ == "__main__":
    key = jax.random.PRNGKey(0)
    x = jax.random.normal(key, (2, 3, 32, 32), jnp.float32)   # NCHW like PyTorch
    model = EfficientNet("efficientnet_b0", num_classes=1000)
    out = model.forward(x)
    logits = jax.block_until_ready(out["output"])
    assert logits.shape == (2, 1000)
    assert bool(jnp.all(jnp.isfinite(logits)))
    print("KERNEL_OK")
</pallas_src>

<mosaic_0001>
module attributes {stable_mosaic.version = 11 : i64} {
  func.func @_mm_kernel(%arg0: i32, %arg1: i32, %arg2: i32, %arg3: memref<1x256x128xbf16, #tpu.memory_space<vmem>>, %arg4: memref<128x128xbf16, #tpu.memory_space<vmem>>, %arg5: memref<1x128xf32, #tpu.memory_space<vmem>>, %arg6: memref<1x128xf32, #tpu.memory_space<vmem>>, %arg7: memref<1x256x128xbf16, #tpu.memory_space<vmem>>) attributes {dimension_semantics = [#tpu.dimension_semantics<parallel>, #tpu.dimension_semantics<parallel>, #tpu.dimension_semantics<parallel>], iteration_bounds = array<i64: 2, 1, 1>, scalar_prefetch = 0 : i64, scratch_operands = 0 : i64, tpu.core_type = #tpu.core_type<tc>, window_params = [{transform_indices = @transform_0, window_bounds = array<i64: 1, 256, 128>}, {transform_indices = @transform_1, window_bounds = array<i64: 128, 128>}, {transform_indices = @transform_2, window_bounds = array<i64: 1, 128>}, {transform_indices = @transform_3, window_bounds = array<i64: 1, 128>}, {transform_indices = @transform_4, window_bounds = array<i64: 1, 256, 128>}]} {
    %c0 = arith.constant 0 : index
    %c0_0 = arith.constant 0 : index
    %c0_1 = arith.constant 0 : index
    %0 = vector.load %arg3[%c0, %c0_0, %c0_1] : memref<1x256x128xbf16, #tpu.memory_space<vmem>>, vector<1x256x128xbf16>
    %1 = vector.shape_cast %0 : vector<1x256x128xbf16> to vector<256x128xbf16>
    %c0_2 = arith.constant 0 : index
    %c0_3 = arith.constant 0 : index
    %2 = vector.load %arg4[%c0_2, %c0_3] : memref<128x128xbf16, #tpu.memory_space<vmem>>, vector<128x128xbf16>
    %cst = arith.constant dense<0.000000e+00> : vector<256x128xf32>
    %3 = tpu.matmul %1, %2, %cst {dimension_numbers = #tpu.dot_dimension_numbers<[1], [0], [0], [1], [0, 0, 1, 1], [], []>} : vector<256x128xbf16>, vector<128x128xbf16>, vector<256x128xf32> -> vector<256x128xf32>
    %c0_4 = arith.constant 0 : index
    %c0_5 = arith.constant 0 : index
    %4 = vector.load %arg5[%c0_4, %c0_5] : memref<1x128xf32, #tpu.memory_space<vmem>>, vector<1x128xf32>
    %5 = vector.broadcast %4 : vector<1x128xf32> to vector<256x128xf32>
    %6 = arith.mulf %3, %5 : vector<256x128xf32>
    %c0_6 = arith.constant 0 : index
    %c0_7 = arith.constant 0 : index
    %7 = vector.load %arg6[%c0_6, %c0_7] : memref<1x128xf32, #tpu.memory_space<vmem>>, vector<1x128xf32>
    %8 = vector.broadcast %7 : vector<1x128xf32> to vector<256x128xf32>
    %9 = arith.addf %6, %8 : vector<256x128xf32>
    %10 = arith.negf %9 : vector<256x128xf32>
    %11 = math.exp %10 : vector<256x128xf32>
    %cst_8 = arith.constant 1.000000e+00 : f32
    %12 = vector.broadcast %cst_8 : f32 to vector<256x128xf32>
    %13 = arith.addf %12, %11 : vector<256x128xf32>
    %14 = arith.divf %12, %13 : vector<256x128xf32>
    %15 = arith.mulf %9, %14 : vector<256x128xf32>
    %16 = arith.truncf %15 : vector<256x128xf32> to vector<256x128xbf16>
    %c0_9 = arith.constant 0 : index
    %c0_10 = arith.constant 0 : index
    %c0_11 = arith.constant 0 : index
    %17 = vector.load %arg7[%c0_9, %c0_10, %c0_11] : memref<1x256x128xbf16, #tpu.memory_space<vmem>>, vector<1x256x128xbf16>
    %18 = vector.shape_cast %17 : vector<1x256x128xbf16> to vector<256x128xbf16>
    %19 = vector.shape_cast %16 : vector<256x128xbf16> to vector<1x256x128xbf16>
    tpu.vector_store %arg7[%c0_9, %c0_10, %c0_11], %19 {strides = array<i32>} : memref<1x256x128xbf16, #tpu.memory_space<vmem>>, vector<1x256x128xbf16>,
    return
  }
  func.func @transform_0(%arg0: i32, %arg1: i32, %arg2: i32) -> (i32, i32, i32) {
    %c0_i32 = arith.constant 0 : i32
    %c0_i32_0 = arith.constant 0 : i32
    return %arg0, %arg1, %c0_i32 : i32, i32, i32
  }
  func.func @transform_1(%arg0: i32, %arg1: i32, %arg2: i32) -> (i32, i32) {
    %c0_i32 = arith.constant 0 : i32
    %c0_i32_0 = arith.constant 0 : i32
    return %c0_i32, %arg2 : i32, i32
  }
  func.func @transform_2(%arg0: i32, %arg1: i32, %arg2: i32) -> (i32, i32) {
    %c0_i32 = arith.constant 0 : i32
    %c0_i32_0 = arith.constant 0 : i32
    return %c0_i32, %arg2 : i32, i32
  }
  func.func @transform_3(%arg0: i32, %arg1: i32, %arg2: i32) -> (i32, i32) {
    %c0_i32 = arith.constant 0 : i32
    %c0_i32_0 = arith.constant 0 : i32
    return %c0_i32, %arg2 : i32, i32
  }
  func.func @transform_4(%arg0: i32, %arg1: i32, %arg2: i32) -> (i32, i32, i32) {
    %c0_i32 = arith.constant 0 : i32
    return %arg0, %arg1, %arg2 : i32, i32, i32
  }
}

</mosaic_0001>

<bundles_post_ra>
// kernel: tpu_custom_call.1
= control target key start
LH: loop header
LB: loop body
LE: loop exit
PB: predicated region body
PF: predicated region fallthrough
CT: control target
= control target key end

     0   :  { %9 = vsyncpa [#allocation3], 0  ;;  %s2486_s0 = inlined_call_operand.hbm [shape: bf16[2,256,128], index: 0, kind: input, shape index: {}]   ;;  %s2487_s1 = inlined_call_operand.hbm [shape: bf16[128,128], index: 1, kind: input, shape index: {}]   ;;  %s2488_s2 = inlined_call_operand.vmem [shape: f32[1,128], index: 2, kind: input, shape index: {}]   ;;  %s2489_s3 = inlined_call_operand.vmem [shape: f32[1,128], index: 3, kind: input, shape index: {}]   ;;  %s2490_s4 = inlined_call_operand.hbm [shape: bf16[2,256,128], index: 4, kind: output, shape index: {}]  }
   0x1   :  { %11 = vsyncpa [#allocation3 + $0x1], 0 }
   0x2   :  { %12 = vsyncpa [#allocation6], 0 }
   0x3   :  { %13 = vsyncpa [#allocation4], 0 }
   0x4   :  { %15 = vsyncpa [#allocation4 + $0x1], 0  ;;  %s1988_s15 = smov 0   ;;  %s1990_s16 = smov 0  }
   0x5   :  { %s1992_s17 = smov 0   ;;  %s1994_s18 = smov 0  }
   0x6   :  { %s1996_s19 = smov 0   ;;  %s1998_s20 = smov 0  }
   0x7 LB: > { %s1255_s21 = sadd.s32 4294967295, %s1954_s20   ;;  %s1256_s22 = sadd.s32 4294967294, %s1954_s20   ;;  %s1954_s20 = sphi %s1998_s20, %s21_s20   ;;  %s1950_s19 = sphi %s1996_s19, %s2514_s19   ;;  %s1946_s18 = sphi %s1994_s18, %s2513_s18   ;;  %s1942_s17 = sphi %s1992_s17, %s2512_s17   ;;  %s1938_s16 = sphi %s1990_s16, %s2511_s16   ;;  %s1934_s15 = sphi %s1988_s15, %s2510_s15  }
   0x8   : > { %p62_p0 = scmp.ne.s32.totalorder %s1938_s16, %s1934_s15  ;;  %p2022_p1 = scmp.eq.s32.totalorder %s1255_s21, 0 }
   0x9   : > { %p2026_p2 = scmp.eq.s32.totalorder %s1255_s21, 1  ;;  %p174_p3 = scmp.eq.s32.totalorder %s1256_s22, 1 }
   0xa   : > { %s2495_s23 = scalar_select %p2022_p1, 1, 0 }
   0xb   : > { %s2496_s24 = scalar_select %p2026_p2, 1, 0 }
   0xc   : > { %p2032_p4 = por %p2022_p1, %p62_p0  ;;  %p1257_p5 = scmp.ge.s32.totalorder %s1954_s20, 1 }
   0xd   : > { %p2037_p6 = por %p174_p3, %p62_p0  ;;  %p181_p7 = scmp.lt.s32.totalorder %s1954_s20, 3 }
   0xe   : > { %s2497_s25 = scalar_select %p2032_p4, 1, 0 }
   0xf   : > { %s2498_s26 = scalar_select %p2037_p6, 1, 0 }
  0x10   : > { %p2042_p8 = pnand %p1257_p5, %p181_p7  ;;  %s1956_s28 = smov [#allocation5]  }
  0x11   : > { %s195_s29 = sshll.u32 %s1956_s28, 4  ;;  %s40_s5 = sadd.s32 1, %s1950_s19  ;;  %s196_s29 = int_to_ptr.vmem [resolvable:$true] %s195_s29 }
  0x12   : > { %s2499_s27 = scalar_select %p2042_p8, 1, 0 }
  0x13   : > { %p1589_p9 = pneg %p2042_p8  ;;  %s1810_s8 = scalar_lea.hbm %s2487_s1, 1024 }
  0x14   : > { %p1811_p12 = scmp.ne.s32.totalorder %s2487_s1, %s1810_s8  ;;  %p1817_p5 = scmp.lt.u32.totalorder %s1810_s8, %s2487_s1 }
  0x15   : > { %p2051_p11 = pnand %p1589_p9, %p2022_p1 }
  0x17   : > { %p1812_p13 = pneg %p2051_p11 }
  0x19   : > { %p1813_p0 = pnand %p1812_p13, %p1811_p12 }
  0x1b   : > { %p1814_p3 = pneg %p1813_p0 }
  0x1d   : > { %p1819_p7 = pnand %p1817_p5, %p1814_p3 }
  0x1f   : > { %1822 = shalt.err (!%p1819_p7)
}
  0x20   : > { %s1823_s13 = scalar_lea.vmem %s196_s29, 1024  ;;  %p1831_p1 = scmp.lt.s32.totalorder %s196_s29, %s196_s29 }
  0x21   : > { %p1824_p9 = scmp.ne.s32.totalorder %s196_s29, %s1823_s13  ;;  %p1832_p4 = scmp.lt.s32.totalorder %s1823_s13, %s1823_s13 }
  0x23   : > { %p1826_p10 = pnand %p1824_p9, %p1812_p13  ;;  %p1833_p8 = por %p1832_p4, %p1831_p1 }
  0x25   : > { %p1827_p6 = pneg %p1826_p10 }
  0x27   : > { %p1834_p2 = pnand %p1833_p8, %p1827_p6 }
  0x29   : > { %1837 = shalt.err (!%p1834_p2)
}
  0x2a   : > { %s1957_s14 = smov 64   ;;  %s1958_s21 = smov 4  }
  0x2b   : > { %1592 = dma.hbm_to_vmem [thread:$0]  (!%p2051_p11), %s2487_s1, 1024, %s196_s29, [#allocation6], %s1957_s14, %s1957_s14, %s1958_s21  }
  0x2c   : > { %p42_p1 = scmp.ge.s32.totalorder %s40_s5, 2  ;;  %s49_s6 = sadd.s32 1, %s1942_s17 }
  0x2d   : > { %p56_p2 = scmp.ne.s32.totalorder %s1942_s17, %s1938_s16  ;;  %p57_p4 = scmp.eq.s32.totalorder %s1954_s20, 0 }
  0x2e   : > { %s2516_s5 = smov (%p42_p1, %s40_s5), 0  ;;  %p2502_p8 = scmp.ne.s32.totalorder %s2496_s24, 0 }
  0x2f   : > { %p2081_p6 = por %p57_p4, %p56_p2  ;;  %s44_s8 = ssub.s32 %s1950_s19, %s2516_s5 }
  0x30   : > { %p2087_p10 = por %p2502_p8, %p56_p2  ;;  %p1602_p12 = scmp.lt.s32.totalorder %s1954_s20, 2 }
  0x31   : > { %p47_p11 = scmp.eq.s32.totalorder %s44_s8, 0  ;;  %s221_s29 = sand.u32 1, %s1942_s17  }
  0x32   : > { %s1262_s9 = sshll.u32 %s221_s29, 7  ;;  %s1364_s11 = sshll.u32 %s1950_s19, 11 }
  0x33   : > { %s2096_s10 = scalar_select %p47_p11, %s1942_s17, %s49_s6  }
  0x34   : > { %s2102_s22 = scalar_lea.hbm %s2486_s0, %s1364_s11  ;;  %s225_s24 = scalar_lea.vmem [#allocation2], %s1262_s9 }
  0x35   : > { %s234_s28 = sshll.u32 %s225_s24, 4  ;;  %p2108_p13 = pnand %p1602_p12, %p2081_p6  ;;  %s2104_s28 = int_to_ptr.vmem [resolvable:$true] %s234_s28 }
  0x36   : > { %s2112_s6 = scalar_lea.sflag [#allocation3], %s221_s29  ;;  %s1838_s12 = scalar_lea.hbm %s2102_s22, 2048 }
  0x37   : > { %p1839_p0 = scmp.ne.s32.totalorder %s2102_s22, %s1838_s12  ;;  %p1840_p3 = pneg %p2108_p13 }
  0x38   : > { %s1843_s7 = scalar_lea.hbm %s2486_s0, 4096  ;;  %p1844_p9 = scmp.lt.u32.totalorder %s2102_s22, %s2486_s0 }
  0x39   : > { %p1841_p5 = pnand %p1840_p3, %p1839_p0  ;;  %p1845_p1 = scmp.lt.u32.totalorder %s1843_s7, %s1838_s12 }
  0x3a   : > { %p1847_p4 = scmp.lt.u32.totalorder %s1838_s12, %s2102_s22 }
  0x3b   : > { %p1842_p7 = pneg %p1841_p5  ;;  %p1846_p2 = por %p1845_p1, %p1844_p9 }
  0x3d   : > { %p1848_p6 = por %p1847_p4, %p1846_p2 }
  0x3f   : > { %p1849_p8 = pnand %p1848_p6, %p1842_p7 }
  0x41   : > { %1852 = shalt.err (!%p1849_p8)
}
  0x42   : > { %s1853_s29 = scalar_lea.vmem %s2104_s28, 2048  ;;  %s1959_s9 = smov [#allocation2]  }
  0x43   : > { %p1854_p12 = scmp.ne.s32.totalorder %s2104_s28, %s1853_s29  ;;  %s1858_s11 = sshll.u32 %s1959_s9, 4  ;;  %s1859_s11 = int_to_ptr.vmem [resolvable:$false] %s1858_s11 }
  0x44   : > { %s1860_s13 = scalar_lea.vmem %s1859_s11, 4096  ;;  %p1861_p5 = scmp.lt.s32.totalorder %s2104_s28, %s1859_s11 }
  0x45   : > { %p1856_p11 = pnand %p1854_p12, %p1840_p3  ;;  %p1862_p9 = scmp.lt.s32.totalorder %s1860_s13, %s1853_s29 }
  0x47   : > { %p1857_p0 = pneg %p1856_p11  ;;  %p1863_p1 = por %p1862_p9, %p1861_p5 }
  0x49   : > { %p1864_p2 = pnand %p1863_p1, %p1857_p0 }
  0x4b   : > { %1867 = shalt.err (!%p1864_p2)
}
  0x4c   : > { %1596 = dma.hbm_to_vmem [thread:$0]  (!%p2108_p13), %s2102_s22, 2048, %s2104_s28, %s2112_s6, %s1957_s14, %s1957_s14, %s1958_s21  }
  0x4d   : > { %p2505_p3 = scmp.ne.s32.totalorder %s2499_s27, 0 }
  0x4e   : > { %s2146_s12 = sand.u32 (!%p2505_p3), 1, %s1938_s16   ;;  %p2506_p7 = scmp.ne.s32.totalorder (!%p2505_p3), %s2497_s25, 0 }
  0x4f   : > { %246 = sbr.rel (%p2505_p3) target bundleno = 441 (0x1b9), region = 36  ;;  %s1266_s7 = sshll.u32 (!%p2505_p3), %s2146_s12, 7 }
  0x50   : > { %s249_s24 = scalar_lea.sflag (!%p2505_p3), [#allocation3], %s2146_s12  ;;  %s2152_s8 = scalar_lea.vmem (!%p2505_p3), [#allocation2], %s1266_s7 }
  0x56   : > { %1921 = dma.done.wait (%p2506_p7), %s249_s24, 2048  }
  0x57   : > { %1923 = vsyncadd (%p2506_p7), %s249_s24, 4294965248  ;;  %p2507_p13 = scmp.ne.s32.totalorder %s2495_s23, 0 }
  0x59   : > { %1925 = dma.done.wait (%p2507_p13), [#allocation6], 1024  }
  0x5a   : > { %1927 = vsyncadd (%p2507_p13), [#allocation6], 4294966272  ;;  %v1658_v0 = vld [vmem:[#allocation5] sm:$0xff]   ;;  %v1659_v1 = vld [vmem:[#allocation5 + $0x8] sm:$0xff]   ;;  %s2342_s21 = scalar_lea.vmem [#allocation7], %s1266_s7  ;;  %s1397_s22 = sshll.u32 %s1946_s18, 11 }
  0x5b   : > { %1517 = vmatprep.subr.bf16.mxu0 %v1658_v0  ;;  %1565 = vmatprep.subr.bf16.mxu1 %v1658_v0  ;;  %v1660_v2 = vld [vmem:[#allocation5 + $0x10] sm:$0xff]   ;;  %v1661_v3 = vld [vmem:[#allocation5 + $0x18] sm:$0xff]   ;;  %v1666_v4 = vld [vmem:[%s2152_s8] sm:$0xff]   ;;  %s1128_s28 = sshll.u32 %s2342_s21, 4  ;;  %s2432_s18 = scalar_lea.hbm %s2490_s4, %s1397_s22  ;;  %s2434_s28 = int_to_ptr.vmem [resolvable:$true] %s1128_s28 }
  0x5c   : > { %1518 = vmatpush3.bf16.msra.mxu0 %v1658_v0  ;;  %1573 = vmatpush3.bf16.msra.mxu1 %v1658_v0  ;;  %v1667_v5 = vld [vmem:[%s2152_s8 + $0x40] sm:$0xff]   ;;  %v1663_v7 = vld [vmem:[#allocation5 + $0x28] sm:$0xff]   ;;  %v1664_v8 = vld [vmem:[#allocation5 + $0x30] sm:$0xff]   ;;  %s1112_s9 = scalar_lea.sflag [#allocation4], %s2146_s12  ;;  %s1868_s11 = scalar_lea.vmem %s2434_s28, 2048 }
  0x5d   : > { %1519 = vmatprep.subr.bf16.mxu0 %v1659_v1  ;;  %1566 = vmatprep.subr.bf16.mxu1 %v1659_v1  ;;  %v1662_v6 = vld [vmem:[#allocation5 + $0x20] sm:$0xff]   ;;  %v1665_v9 = vld [vmem:[#allocation5 + $0x38] sm:$0xff]   ;;  %v1668_v10 = vld [vmem:[%s2152_s8 + $0x8] sm:$0xff]   ;;  %p1869_p4 = scmp.ne.s32.totalorder %s2434_s28, %s1868_s11  ;;  %s1960_s13 = smov [#allocation7]  }
  0x5e   : > { %1533 = vmatprep.mubr.bf16.mxu0 %v1666_v4  ;;  %1549 = vmatprep.mubr.bf16.mxu1 %v1667_v5  ;;  %v1669_v11 = vld [vmem:[%s2152_s8 + $0x48] sm:$0xff]   ;;  %v1670_v12 = vld [vmem:[%s2152_s8 + $0x10] sm:$0xff]   ;;  %v1672_v14 = vld [vmem:[%s2152_s8 + $0x18] sm:$0xff]   ;;  %s1872_s7 = sshll.u32 %s1960_s13, 4  ;;  %s1873_s7 = int_to_ptr.vmem [resolvable:$false] %s1872_s7 }
  0x5f   : > { %v1671_v13 = vld [vmem:[%s2152_s8 + $0x50] sm:$0xff]   ;;  %v1673_v15 = vld [vmem:[%s2152_s8 + $0x58] sm:$0xff]   ;;  %v1674_v16 = vld [vmem:[%s2152_s8 + $0x20] sm:$0xff]   ;;  %p1870_p6 = pnand %p1869_p4, %p2087_p10  ;;  %s1874_s24 = scalar_lea.vmem %s1873_s7, 4096 }
  0x60   : > { %1520 = vmatpush3.bf16.msra.mxu0 %v1659_v1  ;;  %1574 = vmatpush3.bf16.msra.mxu1 %v1659_v1  ;;  %v1675_v17 = vld [vmem:[%s2152_s8 + $0x60] sm:$0xff]   ;;  %v1676_v18 = vld [vmem:[%s2152_s8 + $0x28] sm:$0xff]   ;;  %v1678_v20 = vld [vmem:[%s2152_s8 + $0x30] sm:$0xff]   ;;  %p1875_p12 = scmp.lt.s32.totalorder %s2434_s28, %s1873_s7  ;;  %p1876_p11 = scmp.lt.s32.totalorder %s1874_s24, %s1868_s11 }
  0x61   : > { %1521 = vmatprep.subr.bf16.mxu0 %v1660_v2  ;;  %1567 = vmatprep.subr.bf16.mxu1 %v1660_v2  ;;  %v1677_v19 = vld [vmem:[%s2152_s8 + $0x68] sm:$0xff]   ;;  %v1679_v21 = vld [vmem:[%s2152_s8 + $0x70] sm:$0xff]   ;;  %v1680_v22 = vld [vmem:[%s2152_s8 + $0x38] sm:$0xff]   ;;  %p1871_p8 = pneg %p1870_p6 }
  0x62   : > { %v1681_v23 = vld [vmem:[%s2152_s8 + $0x78] sm:$0xff]   ;;  %v2181_v24 = vld [vmem:[%s2488_s2] ss:$0 sm:$0xff]  ;;  %p1877_p0 = por %p1876_p11, %p1875_p12 }
  0x63   : > { %v2186_v26 = vld [vmem:[%s2489_s3] ss:$0 sm:$0xff] }
  0x64   : > { %1522 = vmatpush3.bf16.msra.mxu0 %v1660_v2  ;;  %1575 = vmatpush3.bf16.msra.mxu1 %v1660_v2  ;;  %p1878_p5 = pnand %p1877_p0, %p1871_p8 }
  0x65   : > { %1523 = vmatprep.subr.bf16.mxu0 %v1661_v3  ;;  %1568 = vmatprep.subr.bf16.mxu1 %v1661_v3 }
  0x68   : > { %1524 = vmatpush3.bf16.msra.mxu0 %v1661_v3  ;;  %1576 = vmatpush3.bf16.msra.mxu1 %v1661_v3 }
  0x69   : > { %1525 = vmatprep.subr.bf16.mxu0 %v1662_v6  ;;  %1569 = vmatprep.subr.bf16.mxu1 %v1662_v6 }
  0x6c   : > { %1526 = vmatpush3.bf16.msra.mxu0 %v1662_v6  ;;  %1577 = vmatpush3.bf16.msra.mxu1 %v1662_v6 }
  0x6d   : > { %1527 = vmatprep.subr.bf16.mxu0 %v1663_v7  ;;  %1570 = vmatprep.subr.bf16.mxu1 %v1663_v7 }
  0x70   : > { %1528 = vmatpush3.bf16.msra.mxu0 %v1663_v7  ;;  %1578 = vmatpush3.bf16.msra.mxu1 %v1663_v7 }
  0x71   : > { %1529 = vmatprep.subr.bf16.mxu0 %v1664_v8  ;;  %1571 = vmatprep.subr.bf16.mxu1 %v1664_v8 }
  0x74   : > { %1530 = vmatpush3.bf16.msra.mxu0 %v1664_v8  ;;  %1579 = vmatpush3.bf16.msra.mxu1 %v1664_v8 }
  0x75   : > { %1531 = vmatprep.subr.bf16.mxu0 %v1665_v9  ;;  %1572 = vmatprep.subr.bf16.mxu1 %v1665_v9 }
  0x78   : > { %1532 = vmatpush3.bf16.msra.mxu0 %v1665_v9  ;;  %1580 = vmatpush3.bf16.msra.mxu1 %v1665_v9 }
  0x7b   : > { %1534 = vmatmul.mubr.bf16.vlgmr.msra.gmra.mrb[0].mxu0 %v1668_v10  ;;  %1550 = vmatmul.mubr.bf16.vlgmr.msra.gmra.mrb[0].mxu1 %v1669_v11 }
  0x7c   : > { %1537 = vmatprep.mubr.bf16.mxu0 %v1670_v12  ;;  %1553 = vmatprep.mubr.bf16.mxu1 %v1671_v13 }
  0x83   : > { %1538 = vmatmul.mubr.bf16.gmra.mrb[4].mxu0 %v1672_v14  ;;  %1554 = vmatmul.mubr.bf16.gmra.mrb[4].mxu1 %v1673_v15 }
  0x84   : > { %1541 = vmatprep.mubr.bf16.mxu0 %v1674_v16  ;;  %1557 = vmatprep.mubr.bf16.mxu1 %v1675_v17 }
  0x8b   : > { %1542 = vmatmul.mubr.bf16.gmra.mrb[8].mxu0 %v1676_v18  ;;  %1558 = vmatmul.mubr.bf16.gmra.mrb[8].mxu1 %v1677_v19 }
  0x8c   : > { %1545 = vmatprep.mubr.bf16.mxu0 %v1678_v20  ;;  %1561 = vmatprep.mubr.bf16.mxu1 %v1679_v21 }
  0x93   : > { %1546 = vmatmul.mubr.bf16.gmra.mrb[12].mxu0 %v1680_v22  ;;  %1562 = vmatmul.mubr.bf16.gmra.mrb[12].mxu1 %v1681_v23 }
 0x14e   : > { %v1535_v25 = vpop.f32.mrb[0].mxu0  ;;  %v1551_v27 = vpop.f32.mrb[0].mxu1 }
 0x14f   : > { %v658_v28 = vmul.f32 %v1535_v25, %v2181_v24  ;;  %v674_v29 = vmul.f32 %v1551_v27, %v2181_v24  ;;  %v522_v30 = vpop.f32.mrb[1].mxu0  ;;  %v586_v31 = vpop.f32.mrb[1].mxu1 }
 0x150   : > { %v656_v32 = vmul.f32 %v2181_v24, %v522_v30  ;;  %v672_v33 = vmul.f32 %v2181_v24, %v586_v31  ;;  %v1536_v34 = vpop.f32.mrb[2].mxu0  ;;  %v1552_v35 = vpop.f32.mrb[2].mxu1 }
 0x151   : > { %v2193_v36 = vadd.f32 %v2186_v26, %v658_v28  ;;  %v2196_v37 = vadd.f32 %v2186_v26, %v674_v29  ;;  %v659_v38 = vmul.f32 %v1536_v34, %v2181_v24  ;;  %v675_v39 = vmul.f32 %v1552_v35, %v2181_v24  ;;  %v525_v40 = vpop.f32.mrb[3].mxu0  ;;  %v589_v41 = vpop.f32.mrb[3].mxu1 }
 0x152   : > { %v2201_v42 = vadd.f32 %v2186_v26, %v656_v32  ;;  %v2204_v43 = vadd.f32 %v2186_v26, %v672_v33  ;;  %v657_v44 = vmul.f32 %v2181_v24, %v525_v40  ;;  %v673_v45 = vmul.f32 %v2181_v24, %v589_v41 }
 0x153   : > { %v1297_v46 = vmul.f32 -1.442695, %v2193_v36  ;;  %v1313_v47 = vmul.f32 -1.442695, %v2196_v37  ;;  %v2211_v48 = vadd.f32 %v2186_v26, %v659_v38  ;;  %v2214_v49 = vadd.f32 %v2186_v26, %v675_v39 }
 0x154   : > { %v1295_v50 = vmul.f32 -1.442695, %v2201_v42  ;;  %v1311_v51 = vmul.f32 -1.442695, %v2204_v43  ;;  %v2219_v52 = vadd.f32 %v2186_v26, %v657_v44  ;;  %v2222_v53 = vadd.f32 %v2186_v26, %v673_v45 }
 0x155   : > { %1682 = vpow2.f32 %v1297_v46  ;;  %v1298_v54 = vmul.f32 -1.442695, %v2211_v48  ;;  %v1314_v55 = vmul.f32 -1.442695, %v2214_v49 }
 0x156   : > { %1684 = vpow2.f32 %v1313_v47  ;;  %v1539_v56 = vpop.f32.mrb[4].mxu0  ;;  %v1555_v57 = vpop.f32.mrb[4].mxu1  ;;  %v1296_v58 = vmul.f32 -1.442695, %v2219_v52  ;;  %v1312_v63 = vmul.f32 -1.442695, %v2222_v53 }
 0x157   : > { %1686 = vpow2.f32 %v1295_v50  ;;  %v662_v59 = vmul.f32 %v1539_v56, %v2181_v24  ;;  %v678_v60 = vmul.f32 %v1555_v57, %v2181_v24  ;;  %v538_v61 = vpop.f32.mrb[5].mxu0  ;;  %v602_v62 = vpop.f32.mrb[5].mxu1 }
 0x158   : > { %1688 = vpow2.f32 %v1311_v51  ;;  %v660_v0 = vmul.f32 %v2181_v24, %v538_v61  ;;  %v676_v1 = vmul.f32 %v2181_v24, %v602_v62  ;;  %v1540_v2 = vpop.f32.mrb[6].mxu0  ;;  %v1556_v3 = vpop.f32.mrb[6].mxu1 }
 0x159   : > { %1690 = vpow2.f32 %v1298_v54  ;;  %v2233_v4 = vadd.f32 %v2186_v26, %v662_v59  ;;  %v2236_v5 = vadd.f32 %v2186_v26, %v678_v60  ;;  %v663_v6 = vmul.f32 %v1540_v2, %v2181_v24  ;;  %v541_v7 = vpop.f32.mrb[7].mxu0  ;;  %v605_v8 = vpop.f32.mrb[7].mxu1 }
 0x15a   : > { %1692 = vpow2.f32 %v1314_v55  ;;  %v2240_v9 = vadd.f32 %v2186_v26, %v660_v0  ;;  %v2243_v10 = vadd.f32 %v2186_v26, %v676_v1  ;;  %v679_v11 = vmul.f32 %v1556_v3, %v2181_v24 }
 0x15b   : > { %1694 = vpow2.f32 %v1296_v58  ;;  %v1301_v12 = vmul.f32 -1.442695, %v2233_v4  ;;  %v1317_v13 = vmul.f32 -1.442695, %v2236_v5  ;;  %v2249_v14 = vadd.f32 %v2186_v26, %v663_v6 }
 0x15c   : > { %1696 = vpow2.f32 %v1312_v63  ;;  %v1299_v15 = vmul.f32 -1.442695, %v2240_v9  ;;  %v1315_v16 = vmul.f32 -1.442695, %v2243_v10  ;;  %v2255_v21 = vadd.f32 %v2186_v26, %v679_v11 }
 0x15d   : > { %1698 = vpow2.f32 %v1301_v12  ;;  %v1302_v17 = vmul.f32 -1.442695, %v2249_v14  ;;  %v661_v28 = vmul.f32 %v2181_v24, %v541_v7  ;;  %v677_v29 = vmul.f32 %v2181_v24, %v605_v8 }
 0x15e   : > { %1700 = vpow2.f32 %v1317_v13  ;;  %v1543_v18 = vpop.f32.mrb[8].mxu0  ;;  %v1559_v19 = vpop.f32.mrb[8].mxu1  ;;  %v2260_v44 = vmul.f32 -1.442695, %v2255_v21 }
 0x15f   : > { %v1683_v20 = vpop.eup %1682  ;;  %1702 = vpow2.f32 %v1299_v15  ;;  %v554_v22 = vpop.f32.mrb[9].mxu0  ;;  %v2263_v47 = vadd.f32 %v2186_v26, %v661_v28  ;;  %v2266_v50 = vadd.f32 %v2186_v26, %v677_v29  ;;  %v666_v55 = vmul.f32 %v1543_v18, %v2181_v24 }
 0x160   : > { %v618_v23 = vpop.f32.mrb[9].mxu1  ;;  %v1685_v25 = vpop.eup %1684  ;;  %v825_v27 = vadd.f32 1.0, %v1683_v20  ;;  %1704 = vpow2.f32 %v1315_v16  ;;  %v682_v56 = vmul.f32 %v1559_v19, %v2181_v24  ;;  %v664_v59 = vmul.f32 %v2181_v24, %v554_v22 }
 0x161   : > { %v1544_v30 = vpop.f32.mrb[10].mxu0  ;;  %v1560_v31 = vpop.f32.mrb[10].mxu1  ;;  %v841_v33 = vadd.f32 1.0, %v1685_v25  ;;  %1706 = vpow2.f32 %v1302_v17  ;;  %v680_v60 = vmul.f32 %v2181_v24, %v618_v23  ;;  %v1300_v11 = vmul.f32 -1.442695, %v2263_v47 }
 0x162   : > { %v1687_v32 = vpop.eup %1686  ;;  %v557_v34 = vpop.f32.mrb[11].mxu0  ;;  %1708 = vrcp.f32 %v825_v27  ;;  %v667_v1 = vmul.f32 %v1544_v30, %v2181_v24  ;;  %v683_v2 = vmul.f32 %v1560_v31, %v2181_v24  ;;  %v2285_v18 = vadd.f32 %v2186_v26, %v666_v55 }
 0x163   : > { %v1689_v35 = vpop.eup %1688  ;;  %v823_v38 = vadd.f32 1.0, %v1687_v32  ;;  %v621_v39 = vpop.f32.mrb[11].mxu1  ;;  %1710 = vrcp.f32 %v841_v33  ;;  %v665_v12 = vmul.f32 %v2181_v24, %v557_v34  ;;  %v2288_v19 = vadd.f32 %v2186_v26, %v682_v56 }
 0x164   : > { %v1691_v40 = vpop.eup %1690  ;;  %v839_v41 = vadd.f32 1.0, %v1689_v35  ;;  %v2295_v27 = vadd.f32 %v2186_v26, %v664_v59  ;;  %v2298_v28 = vadd.f32 %v2186_v26, %v680_v60  ;;  %v2301_v31 = vadd.f32 %v2186_v26, %v667_v1 }
 0x165   : > { %v1693_v45 = vpop.eup %1692  ;;  %1712 = vrcp.f32 %v823_v38  ;;  %v826_v46 = vadd.f32 1.0, %v1691_v40  ;;  %v2304_v32 = vadd.f32 %v2186_v26, %v683_v2  ;;  %v2307_v35 = vadd.f32 %v2186_v26, %v665_v12 }
 0x166   : > { %v1695_v51 = vpop.eup %1694  ;;  %1714 = vrcp.f32 %v839_v41  ;;  %v842_v54 = vadd.f32 1.0, %v1693_v45  ;;  %v1547_v61 = vpop.f32.mrb[12].mxu0  ;;  %v681_v38 = vmul.f32 %v2181_v24, %v621_v39  ;;  %v1316_v41 = vmul.f32 -1.442695, %v2266_v50 }
 0x167   : > { %v1697_v57 = vpop.eup %1696  ;;  %1716 = vrcp.f32 %v826_v46  ;;  %v824_v58 = vadd.f32 1.0, %v1695_v51  ;;  %v1563_v62 = vpop.f32.mrb[12].mxu1  ;;  %v1305_v45 = vmul.f32 -1.442695, %v2285_v18  ;;  %v1321_v51 = vmul.f32 -1.442695, %v2288_v19 }
 0x168   : > { %v1699_v63 = vpop.eup %1698  ;;  %1718 = vrcp.f32 %v842_v54  ;;  %v840_v0 = vadd.f32 1.0, %v1697_v57  ;;  %v2274_v3 = vpop.f32.mrb[13].mxu0  ;;  %v670_v54 = vmul.f32 %v1547_v61, %v2181_v24  ;;  %v686_v55 = vmul.f32 %v1563_v62, %v2181_v24 }
 0x169   : > { %v2276_v6 = vpop.f32.mrb[13].mxu1  ;;  %v1701_v7 = vpop.eup %1700  ;;  %1720 = vrcp.f32 %v824_v58  ;;  %v829_v8 = vadd.f32 1.0, %v1699_v63  ;;  %v1303_v57 = vmul.f32 -1.442695, %v2295_v27  ;;  %v1319_v39 = vmul.f32 -1.442695, %v2298_v28 }
 0x16a   : > { %v2280_v13 = vpop.f32.mrb[14].mxu0  ;;  %v2282_v15 = vpop.f32.mrb[14].mxu1  ;;  %1722 = vrcp.f32 %v840_v0  ;;  %v845_v17 = vadd.f32 1.0, %v1701_v7  ;;  %v1306_v58 = vmul.f32 -1.442695, %v2301_v31  ;;  %v2322_v0 = vadd.f32 %v2186_v26, %v681_v38 }
 0x16b   : > { %v1703_v16 = vpop.eup %1702  ;;  %v2290_v20 = vpop.f32.mrb[15].mxu0  ;;  %1724 = vrcp.f32 %v829_v8  ;;  %v1322_v60 = vmul.f32 -1.442695, %v2304_v32  ;;  %v1304_v63 = vmul.f32 -1.442695, %v2307_v35  ;;  %v2329_v8 = vadd.f32 %v2186_v26, %v670_v54 }
 0x16c   : > { %v2292_v22 = vpop.f32.mrb[15].mxu1  ;;  %v1705_v23 = vpop.eup %1704  ;;  %v827_v25 = vadd.f32 1.0, %v1703_v16  ;;  %1726 = vrcp.f32 %v845_v17 }
 0x16d   : > { %v1707_v29 = vpop.eup %1706  ;;  %v843_v30 = vadd.f32 1.0, %v1705_v23 }
 0x16e   : > { %v1709_v33 = vpop.eup %1708  ;;  %1728 = vrcp.f32 %v827_v25  ;;  %v830_v34 = vadd.f32 1.0, %v1707_v29 }
 0x16f   : > { %v1711_v40 = vpop.eup %1710  ;;  %1730 = vrcp.f32 %v843_v30  ;;  %v921_v62 = vmul.f32 %v1709_v33, %v2193_v36 }
 0x170   : > { %v1713_v46 = vpop.eup %1712  ;;  %1732 = vrcp.f32 %v830_v34 }
 0x171   : > { %v1715_v56 = vpop.eup %1714  ;;  %1734 = vpow2.f32 %v2260_v44  ;;  %v937_v44 = vmul.f32 %v1711_v40, %v2196_v37  ;;  %v919_v16 = vmul.f32 %v1713_v46, %v2201_v42 }
 0x172   : > { %v1717_v59 = vpop.eup %1716  ;;  %1736 = vpow2.f32 %v1300_v11  ;;  %v2332_v11 = vadd.f32 %v2186_v26, %v686_v55  ;;  %v935_v17 = vmul.f32 %v1715_v56, %v2204_v43 }
 0x173   : > { %v1719_v61 = vpop.eup %1718  ;;  %v922_v1 = vmul.f32 %v1717_v59, %v2211_v48  ;;  %1738 = vpow2.f32 %v1316_v41 }
 0x174   : > { %v1721_v2 = vpop.eup %1720  ;;  %v938_v7 = vmul.f32 %v1719_v61, %v2214_v49  ;;  %1740 = vpow2.f32 %v1305_v45  ;;  %v1325_v33 = vmul.f32 -1.442695, %v2332_v11 }
 0x175   : > { %v1723_v12 = vpop.eup %1722  ;;  %v1406_v36 = vpack.c.bf16 %v922_v1, %v921_v62  ;;  %v920_v37 = vmul.f32 %v1721_v2, %v2219_v52  ;;  %1742 = vpow2.f32 %v1321_v51  ;;  %v1320_v52 = vmul.f32 -1.442695, %v2322_v0 }
 0x176   : > { %v1725_v48 = vpop.eup %1724  ;;  %v1446_v23 = vpack.c.bf16 %v938_v7, %v937_v44  ;;  %v936_v49 = vmul.f32 %v1723_v12, %v2222_v53  ;;  %1744 = vpow2.f32 %v1303_v57  ;;  %v1309_v53 = vmul.f32 -1.442695, %v2329_v8 }
 0x177   : > { %v2338_v25 = vpop.eup %1726  ;;  %1478 = vst [vmem:[%s2342_s21 + $0x8] sm:$0xff] %v1406_v36   ;;  %v1401_v42 = vpack.c.bf16 %v920_v37, %v919_v16  ;;  %1746 = vpow2.f32 %v1319_v39  ;;  %v925_v40 = vmul.f32 %v1725_v48, %v2233_v4  ;;  %v668_v4 = vmul.f32 %v2181_v24, %v2274_v3 }
 0x178   : > { %v2346_v29 = vpop.eup %1728  ;;  %1486 = vst [vmem:[%s2342_s21 + $0x48] sm:$0xff] %v1446_v23   ;;  %v1441_v43 = vpack.c.bf16 %v936_v49, %v935_v17  ;;  %1748 = vpow2.f32 %v1306_v58  ;;  %v671_v62 = vmul.f32 %v2280_v13, %v2181_v24  ;;  %v687_v2 = vmul.f32 %v2282_v15, %v2181_v24 }
 0x179   : > { %v2350_v30 = vpop.eup %1730  ;;  %1402 = vst [vmem:[%s2342_s21] sm:$0xff] %v1401_v42   ;;  %1750 = vpow2.f32 %v1322_v60  ;;  %v684_v60 = vmul.f32 %v2181_v24, %v2276_v6  ;;  %v2367_v12 = vadd.f32 %v2186_v26, %v668_v4  ;;  %v669_v6 = vmul.f32 %v2181_v24, %v2290_v20 }
 0x17a   : > { %v1733_v34 = vpop.eup %1732  ;;  %1485 = vst [vmem:[%s2342_s21 + $0x40] sm:$0xff] %v1441_v43   ;;  %1752 = vpow2.f32 %v1304_v63  ;;  %v685_v37 = vmul.f32 %v2181_v24, %v2292_v22  ;;  %v2377_v17 = vadd.f32 %v2186_v26, %v671_v62  ;;  %v2380_v20 = vadd.f32 %v2186_v26, %v687_v2 }
 0x17b   : > { %v1735_v38 = vpop.eup %1734  ;;  %v926_v41 = vmul.f32 %v1733_v34, %v2249_v14  ;;  %1754 = vpow2.f32 %v1320_v52  ;;  %v2372_v13 = vadd.f32 %v2186_v26, %v684_v60  ;;  %v1307_v52 = vmul.f32 -1.442695, %v2367_v12 }
 0x17c   : > { %v1737_v45 = vpop.eup %1736  ;;  %v846_v46 = vadd.f32 1.0, %v1735_v38  ;;  %1756 = vpow2.f32 %v1309_v53  ;;  %v2384_v43 = vadd.f32 %v2186_v26, %v669_v6  ;;  %v2388_v53 = vadd.f32 %v2186_v26, %v685_v37 }
 0x17d   : > { %v1739_v51 = vpop.eup %1738  ;;  %v1416_v54 = vpack.c.bf16 %v926_v41, %v925_v40  ;;  %v828_v55 = vadd.f32 1.0, %v1737_v45  ;;  %1758 = vpow2.f32 %v1325_v33  ;;  %v1323_v22 = vmul.f32 -1.442695, %v2372_v13 }
 0x17e   : > { %v1741_v56 = vpop.eup %1740  ;;  %1760 = vrcp.f32 %v846_v46  ;;  %v844_v57 = vadd.f32 1.0, %v1739_v51  ;;  %v941_v34 = vmul.f32 %v2338_v25, %v2236_v5  ;;  %v1310_v40 = vmul.f32 -1.442695, %v2377_v17 }
 0x17f   : > { %v1743_v39 = vpop.eup %1742  ;;  %1480 = vst [vmem:[%s2342_s21 + $0x18] sm:$0xff] %v1416_v54   ;;  %1762 = vrcp.f32 %v828_v55  ;;  %v833_v58 = vadd.f32 1.0, %v1741_v56  ;;  %v923_v45 = vmul.f32 %v2346_v29, %v2240_v9  ;;  %v939_v46 = vmul.f32 %v2350_v30, %v2243_v10 }
 0x180   : > { %v1745_v59 = vpop.eup %1744  ;;  %1764 = vrcp.f32 %v844_v57  ;;  %v849_v14 = vadd.f32 1.0, %v1743_v39  ;;  %v1326_v26 = vmul.f32 -1.442695, %v2380_v20  ;;  %v1324_v9 = vmul.f32 -1.442695, %v2388_v53 }
 0x181   : > { %v1747_v63 = vpop.eup %1746  ;;  %1766 = vrcp.f32 %v833_v58  ;;  %v831_v61 = vadd.f32 1.0, %v1745_v59 }
 0x182   : > { %v1749_v44 = vpop.eup %1748  ;;  %1768 = vrcp.f32 %v849_v14  ;;  %v847_v1 = vadd.f32 1.0, %v1747_v63 }
 0x183   : > { %v1751_v7 = vpop.eup %1750  ;;  %1770 = vrcp.f32 %v831_v61  ;;  %v834_v3 = vadd.f32 1.0, %v1749_v44 }
 0x184   : > { %v1753_v16 = vpop.eup %1752  ;;  %1772 = vrcp.f32 %v847_v1  ;;  %v850_v36 = vadd.f32 1.0, %v1751_v7 }
 0x185   : > { %v1755_v48 = vpop.eup %1754  ;;  %1774 = vrcp.f32 %v834_v3  ;;  %v832_v15 = vadd.f32 1.0, %v1753_v16 }
 0x186   : > { %v1757_v23 = vpop.eup %1756  ;;  %1776 = vrcp.f32 %v850_v36  ;;  %v848_v49 = vadd.f32 1.0, %v1755_v48 }
 0x187   : > { %v1759_v42 = vpop.eup %1758  ;;  %1778 = vrcp.f32 %v832_v15  ;;  %v837_v62 = vadd.f32 1.0, %v1757_v23 }
 0x188   : > { %v1761_v24 = vpop.eup %1760  ;;  %1780 = vrcp.f32 %v848_v49  ;;  %v853_v1 = vadd.f32 1.0, %v1759_v42 }
 0x189   : > { %v1763_v33 = vpop.eup %1762  ;;  %v942_v38 = vmul.f32 %v1761_v24, %v2255_v21  ;;  %1782 = vpow2.f32 %v1307_v52  ;;  %v1308_v21 = vmul.f32 -1.442695, %v2384_v43 }
 0x18a   : > { %v1765_v41 = vpop.eup %1764  ;;  %v924_v51 = vmul.f32 %v1763_v33, %v2263_v47  ;;  %1784 = vpow2.f32 %v1323_v22 }
 0x18b   : > { %v1767_v54 = vpop.eup %1766  ;;  %v1456_v55 = vpack.c.bf16 %v942_v38, %v941_v34  ;;  %v940_v5 = vmul.f32 %v1765_v41, %v2266_v50  ;;  %1786 = vpow2.f32 %v1310_v40 }
 0x18c   : > { %v1769_v25 = vpop.eup %1768  ;;  %v1411_v56 = vpack.c.bf16 %v924_v51, %v923_v45  ;;  %1788 = vpow2.f32 %v1326_v26  ;;  %v929_v50 = vmul.f32 %v1767_v54, %v2285_v18 }
 0x18d   : > { %v1771_v29 = vpop.eup %1770  ;;  %1488 = vst [vmem:[%s2342_s21 + $0x58] sm:$0xff] %v1456_v55   ;;  %v1451_v10 = vpack.c.bf16 %v940_v5, %v939_v46  ;;  %1790 = vpow2.f32 %v1308_v21  ;;  %v945_v4 = vmul.f32 %v1769_v25, %v2288_v19 }
 0x18e   : > { %v1773_v47 = vpop.eup %1772  ;;  %1479 = vst [vmem:[%s2342_s21 + $0x10] sm:$0xff] %v1411_v56   ;;  %1792 = vpow2.f32 %v1324_v9  ;;  %v927_v60 = vmul.f32 %v1771_v29, %v2295_v27 }
 0x18f   : > { %v1775_v30 = vpop.eup %1774  ;;  %1487 = vst [vmem:[%s2342_s21 + $0x50] sm:$0xff] %v1451_v10   ;;  %v943_v18 = vmul.f32 %v1773_v47, %v2298_v28  ;;  %1794 = vrcp.f32 %v837_v62 }
 0x190   : > { %v1777_v57 = vpop.eup %1776  ;;  %v930_v39 = vmul.f32 %v1775_v30, %v2301_v31  ;;  %1796 = vrcp.f32 %v853_v1 }
 0x191   : > { %v1779_v58 = vpop.eup %1778  ;;  %v946_v59 = vmul.f32 %v1777_v57, %v2304_v32 }
 0x192   : > { %v1781_v14 = vpop.eup %1780  ;;  %v1426_v63 = vpack.c.bf16 %v930_v39, %v929_v50  ;;  %v928_v61 = vmul.f32 %v1779_v58, %v2307_v35 }
 0x193   : > { %v1466_v44 = vpack.c.bf16 %v946_v59, %v945_v4  ;;  %v944_v31 = vmul.f32 %v1781_v14, %v2322_v0  ;;  %v1783_v19 = vpop.eup %1782 }
 0x194   : > { %1482 = vst [vmem:[%s2342_s21 + $0x28] sm:$0xff] %v1426_v63   ;;  %v1421_v2 = vpack.c.bf16 %v928_v61, %v927_v60  ;;  %v1785_v7 = vpop.eup %1784  ;;  %v835_v27 = vadd.f32 1.0, %v1783_v19 }
 0x195   : > { %1490 = vst [vmem:[%s2342_s21 + $0x68] sm:$0xff] %v1466_v44   ;;  %v1461_v32 = vpack.c.bf16 %v944_v31, %v943_v18  ;;  %v1787_v3 = vpop.eup %1786  ;;  %v851_v35 = vadd.f32 1.0, %v1785_v7 }
 0x196   : > { %1481 = vst [vmem:[%s2342_s21 + $0x20] sm:$0xff] %v1421_v2   ;;  %v1789_v6 = vpop.eup %1788  ;;  %1798 = vrcp.f32 %v835_v27  ;;  %v838_v28 = vadd.f32 1.0, %v1787_v3 }
 0x197   : > { %1489 = vst [vmem:[%s2342_s21 + $0x60] sm:$0xff] %v1461_v32   ;;  %v1791_v16 = vpop.eup %1790  ;;  %1800 = vrcp.f32 %v851_v35  ;;  %v854_v0 = vadd.f32 1.0, %v1789_v6 }
 0x198   : > { %v1793_v36 = vpop.eup %1792  ;;  %1802 = vrcp.f32 %v838_v28  ;;  %v836_v37 = vadd.f32 1.0, %v1791_v16 }
 0x199   : > { %1804 = vrcp.f32 %v854_v0  ;;  %v852_v48 = vadd.f32 1.0, %v1793_v36  ;;  %v1795_v15 = vpop.eup %1794 }
 0x19a   : > { %1806 = vrcp.f32 %v836_v37  ;;  %v1797_v23 = vpop.eup %1796  ;;  %v933_v22 = vmul.f32 %v1795_v15, %v2329_v8 }
 0x19b   : > { %1808 = vrcp.f32 %v852_v48  ;;  %v949_v38 = vmul.f32 %v1797_v23, %v2332_v11 }
 0x1a0   : > { %v1799_v49 = vpop.eup %1798 }
 0x1a1   : > { %v1801_v42 = vpop.eup %1800  ;;  %v931_v45 = vmul.f32 %v1799_v49, %v2367_v12 }
 0x1a2   : > { %v1803_v52 = vpop.eup %1802 }
 0x1a3   : > { %v1805_v24 = vpop.eup %1804  ;;  %v934_v33 = vmul.f32 %v1803_v52, %v2377_v17  ;;  %v947_v17 = vmul.f32 %v1801_v42, %v2372_v13 }
 0x1a4   : > { %v1807_v34 = vpop.eup %1806  ;;  %v950_v40 = vmul.f32 %v1805_v24, %v2380_v20 }
 0x1a5   : > { %v1809_v41 = vpop.eup %1808  ;;  %v1436_v46 = vpack.c.bf16 %v934_v33, %v933_v22  ;;  %v932_v8 = vmul.f32 %v1807_v34, %v2384_v43 }
 0x1a6   : > { %v1476_v51 = vpack.c.bf16 %v950_v40, %v949_v38  ;;  %v948_v26 = vmul.f32 %v1809_v41, %v2388_v53 }
 0x1a7   : > { %1484 = vst [vmem:[%s2342_s21 + $0x38] sm:$0xff] %v1436_v46   ;;  %v1431_v11 = vpack.c.bf16 %v932_v8, %v931_v45 }
 0x1a8   : > { %1492 = vst [vmem:[%s2342_s21 + $0x78] sm:$0xff] %v1476_v51   ;;  %v1471_v12 = vpack.c.bf16 %v948_v26, %v947_v17 }
 0x1a9   : > { %1483 = vst [vmem:[%s2342_s21 + $0x30] sm:$0xff] %v1431_v11  }
 0x1aa   : > { %1491 = vst [vmem:[%s2342_s21 + $0x70] sm:$0xff] %v1471_v12  }
 0x1ab   : > { %1881 = shalt.err (!%p1878_p5)
}
 0x1ac   : > { %s1882_s8 = scalar_lea.hbm %s2432_s18, 2048  ;;  %s1886_s27 = scalar_lea.hbm %s2490_s4, 4096 }
 0x1ad   : > { %p1883_p9 = scmp.ne.s32.totalorder %s2432_s18, %s1882_s8  ;;  %p1887_p3 = scmp.lt.u32.totalorder %s2432_s18, %s2490_s4 }
 0x1ae   : > { %p1888_p7 = scmp.lt.u32.totalorder %s1886_s27, %s1882_s8  ;;  %p1890_p4 = scmp.lt.u32.totalorder %s1882_s8, %s2432_s18 }
 0x1af   : > { %p1884_p1 = pnand %p1883_p9, %p2087_p10 }
 0x1b0   : > { %p1889_p13 = por %p1888_p7, %p1887_p3 }
 0x1b1   : > { %p1885_p2 = pneg %p1884_p1 }
 0x1b2   : > { %p1891_p6 = por %p1890_p4, %p1889_p13 }
 0x1b4   : > { %p1892_p8 = pnand %p1891_p6, %p1885_p2 }
 0x1b6   : > { %1895 = shalt.err (!%p1892_p8)
}
 0x1b7   : > { %s1961_s22 = smov 64   ;;  %s1962_s6 = smov 4  }
 0x1b8   : > { %1587 = dma.vmem_to_hbm [thread:$0]  (%p2087_p10), %s2434_s28, 2048, %s2432_s18, %s1112_s9, %s1961_s22, %s1961_s22, %s1962_s6  }
 0x1b9 PF: > { %s1143_s29 = sand.u32 1, %s1934_s15   ;;  %p2508_p12 = scmp.ne.s32.totalorder %s2498_s26, 0 }
 0x1ba   : > { %p2509_p11 = scmp.ge.s32.totalorder %s1954_s20, 2  ;;  %s1144_s11 = scalar_lea.sflag [#allocation4], %s1143_s29 }
 0x1bc   : > { %p1598_p0 = pnand %p2509_p11, %p2508_p12 }
 0x1be   : > { %1929 = dma.done.wait (!%p1598_p0), %s1144_s11, 2048  }
 0x1bf   : > { %1931 = vsyncadd (!%p1598_p0), %s1144_s11, 4294965248  ;;  %s21_s20 = sadd.s32 1, %s1954_s20   ;;  %s2510_s15 = smov %s1938_s16 }
 0x1c0   : > { %p18_p5 = scmp.ge.s32.totalorder %s21_s20, 4   ;;  %s2511_s16 = smov %s1942_s17 }
 0x1c1   : > { %s2512_s17 = smov %s2096_s10  ;;  %s2513_s18 = smov %s1950_s19 }
 0x1c2   : > { %s2514_s19 = smov %s2516_s5  ;;  %20 = sbr.rel (!%p18_p5) target bundleno = 7 (0x7), region = 92 }
 0x1c9   :  { %1149 = vsyncpa [#allocation3], 1 }
 0x1ca   :  { %1151 = vsyncpa [#allocation3 + $0x1], 1 }
 0x1cb   :  { %1152 = vsyncpa [#allocation6], 1 }
 0x1cc   :  { %1153 = vsyncpa [#allocation4], 1 }
 0x1cd   :  { %1155 = vsyncpa [#allocation4 + $0x1], 1 }

</bundles_post_ra>
